<compile_context>
chip_gen: v6e
topology: v6e:2x2x1
jax: 0.10.0
libtpu: 0.0.40
codegen_flags: <defaults>
</compile_context>

<pallas_src>
import jax
import jax.numpy as jnp
from jax.experimental import pallas as pl
from jax.experimental.pallas import tpu as pltpu

HIDDEN = 128
BN_EPS = 1e-5


# --------------------------------------------------------------------------
# Kernel
# --------------------------------------------------------------------------
def baseline_few_kernel(x_ref, w1_ref, p_ref, o_ref, h_acc):
    """Grid axis 0 tiles the fc1 contraction dim (K = padded input_dim).

    p_ref is a packed (4, HIDDEN) f32 slab:
      row 0 = gamma, row 1 = beta, row 2 = fc4 weight row, row 3[0] = fc4 bias.
    """
    k = pl.program_id(0)
    nk = pl.num_programs(0)

    @pl.when(k == 0)
    def _():
        h_acc[...] = jnp.zeros_like(h_acc)

    # fc1 partial product on the MXU (bf16 or f32 operands), f32 accumulation.
    h_acc[...] += jnp.dot(x_ref[...], w1_ref[...],
                          preferred_element_type=jnp.float32)

    @pl.when(k == nk - 1)
    def _():
        h = h_acc[...]                                    # (B, HIDDEN) f32
        inv_b = 1.0 / h.shape[0]

        # --- BatchNorm1d (training mode), two-pass stats (matches reference),
        #     folded into one per-feature FMA ---
        mean = jnp.sum(h, axis=0, keepdims=True) * inv_b  # (1, H)
        c = h - mean
        var = jnp.sum(c * c, axis=0, keepdims=True) * inv_b   # biased variance
        gamma = p_ref[0:1, :]
        beta = p_ref[1:2, :]
        scale = gamma * jax.lax.rsqrt(var + BN_EPS)       # (1, H)
        shift = beta - mean * scale                       # (1, H)
        h = jnp.maximum(h * scale + shift, 0.0)           # BN + ReLU

        # --- fc4: contract HIDDEN of the (1,H) weight row with (B,H) h ->
        #     lane-dense (1, B) row directly. ---
        w4row = p_ref[2:3, :]                             # (1, H)
        b4 = p_ref[3:4, 0:1]                              # (1, 1)
        y = jax.lax.dot_general(
            w4row, h, (((1,), (1,)), ((), ())),
            preferred_element_type=jnp.float32) + b4       # (1, B)

        # --- ReLU -> Sigmoid (final ReLU is a no-op on sigmoid's range) ---
        y = jax.nn.sigmoid(jnp.maximum(y, 0.0))
        o_ref[...] = y.astype(o_ref.dtype)


# --------------------------------------------------------------------------
# Tiling / VMEM helpers
# --------------------------------------------------------------------------
def _vmem_capacity_bytes():
    """Per-core VMEM capacity; conservative v7x fallback if query unavailable."""
    try:
        info = pltpu.get_tpu_info()
        cap = getattr(info, "vmem_capacity_bytes", None)
        if cap:
            return int(cap)
    except Exception:
        pass
    return 64 << 20


def _footprint_bytes(batch, tk, stream_bytes):
    return (2 * (batch * tk + tk * HIDDEN) * stream_bytes  # 2x-buffered x / w1 tiles
            + batch * HIDDEN * 4                           # resident f32 accumulator
            + 2 * (4 * HIDDEN + batch) * 4                 # packed params + (1,B) out
            + (2 << 20))                                   # compiler slack


def _choose_tiling(d, batch, vmem_cap, stream_bytes):
    """Largest K tile (128..4096) whose double-buffered tiles + accumulator fit
    comfortably within this generation's VMEM. Pads D up to a tk multiple."""
    budget = max(vmem_cap - (8 << 20), 8 << 20)
    d_pow = max(pl.next_power_of_2(d), 128)
    tk = 128
    for cand in (256, 512, 1024, 2048, 4096):
        if cand > d_pow:
            break
        if _footprint_bytes(batch, cand, stream_bytes) <= budget:
            tk = cand
    d_pad = pl.cdiv(d, tk) * tk
    return tk, d_pad


def _vmem_limit_bytes(batch, tk, stream_bytes, vmem_cap):
    fp = _footprint_bytes(batch, tk, stream_bytes)
    return int(min(max(fp, 4 << 20), vmem_cap - (8 << 20)))


# --------------------------------------------------------------------------
# Wrapper
# --------------------------------------------------------------------------
def baseline_few_forward(x, w1, gamma, beta, w4_row, b4, *,
                         matmul_dtype=jnp.bfloat16):
    """x: (B, D); w1: (D, 128); gamma/beta/w4_row: (1, 128); b4: (1, 1).

    Returns (B, 1) float32, matching the PyTorch module's forward output.
    matmul_dtype=jnp.bfloat16 (default) streams x/w1 in bf16 with f32
    accumulation; matmul_dtype=None keeps the exact f32 path.
    """
    B, D = x.shape
    stream_bytes = 2 if matmul_dtype == jnp.bfloat16 else 4
    vmem_cap = _vmem_capacity_bytes()
    tk, d_pad = _choose_tiling(D, B, vmem_cap, stream_bytes)
    nk = d_pad // tk

    # Zero-pad the contraction dim: pads contribute exactly 0 to h_acc.
    if d_pad != D:
        x = jnp.pad(x, ((0, 0), (0, d_pad - D)))
        w1 = jnp.pad(w1, ((0, d_pad - D), (0, 0)))

    # Cast in the wrapper so the HBM->VMEM streams themselves are half-width.
    if matmul_dtype is not None:
        x = x.astype(matmul_dtype)
        w1 = w1.astype(matmul_dtype)

    # Pack the small per-feature vectors into one slab -> single input DMA.
    b4_row = jnp.pad(b4.reshape(1, 1).astype(jnp.float32),
                     ((0, 0), (0, HIDDEN - 1)))
    packed = jnp.concatenate(
        [gamma.astype(jnp.float32), beta.astype(jnp.float32),
         w4_row.astype(jnp.float32), b4_row], axis=0)      # (4, HIDDEN)

    out_row = pl.pallas_call(
        baseline_few_kernel,
        out_shape=jax.ShapeDtypeStruct((1, B), jnp.float32),
        grid_spec=pltpu.PrefetchScalarGridSpec(
            num_scalar_prefetch=0,
            grid=(nk,),
            in_specs=[
                pl.BlockSpec((B, tk), lambda k: (0, k)),          # x K-tile
                pl.BlockSpec((tk, HIDDEN), lambda k: (k, 0)),     # w1 K-tile
                pl.BlockSpec((4, HIDDEN), lambda k: (0, 0)),      # packed params
            ],
            out_specs=pl.BlockSpec((1, B), lambda k: (0, 0)),     # lane-dense row
            scratch_shapes=[pltpu.VMEM((B, HIDDEN), jnp.float32)],
        ),
        compiler_params=pltpu.CompilerParams(
            dimension_semantics=("arbitrary",),                   # K is a reduction
            vmem_limit_bytes=_vmem_limit_bytes(B, tk, stream_bytes, vmem_cap),
        ),
    )(x, w1, packed)

    return out_row.reshape(B, 1)


# --------------------------------------------------------------------------
# Params / reference
# --------------------------------------------------------------------------
def init_params(key, input_dim):
    """Xavier-normal (gain=1.0) linear weights, zero biases, BN gamma=1/beta=0
    -- mirrors Baseline_few._init_weights. fc1 bias omitted (zero & cancelled
    by training-mode BatchNorm)."""
    k1, k2 = jax.random.split(key)
    std1 = (2.0 / (input_dim + HIDDEN)) ** 0.5
    std4 = (2.0 / (HIDDEN + 1)) ** 0.5
    w1 = jax.random.normal(k1, (input_dim, HIDDEN), jnp.float32) * std1  # (D, H)
    gamma = jnp.ones((1, HIDDEN), jnp.float32)
    beta = jnp.zeros((1, HIDDEN), jnp.float32)
    w4_row = jax.random.normal(k2, (1, HIDDEN), jnp.float32) * std4      # (out, in)
    b4 = jnp.zeros((1, 1), jnp.float32)
    return w1, gamma, beta, w4_row, b4


def reference_forward(x, w1, gamma, beta, w4_row, b4):
    """Pure-JAX reference with the module's literal math (two-pass BN stats)."""
    h = x @ w1                                   # fc1 bias = 0
    mean = jnp.mean(h, axis=0, keepdims=True)
    var = jnp.mean((h - mean) ** 2, axis=0, keepdims=True)
    h = (h - mean) / jnp.sqrt(var + BN_EPS) * gamma + beta
    h = jnp.maximum(h, 0.0)
    y = jnp.maximum(h @ w4_row.T + b4, 0.0)
    return jax.nn.sigmoid(y)                     # final ReLU is a no-op


# --------------------------------------------------------------------------
# Main
# --------------------------------------------------------------------------
if __name__ == "__main__":
    key = jax.random.PRNGKey(0)
    kx, kp = jax.random.split(key)

    batch, input_dim = 8, 32
    x = jax.random.normal(kx, (batch, input_dim), jnp.float32)
    params = init_params(kp, input_dim)

    ref = reference_forward(x, *params)

    # Exact f32 streaming path: must match the JAX reference tightly.
    out_f32 = jax.block_until_ready(
        baseline_few_forward(x, *params, matmul_dtype=None))
    assert out_f32.shape == (batch, 1)
    assert jnp.allclose(out_f32, ref, atol=1e-5, rtol=1e-5), \
        "f32 path mismatch vs JAX reference"

    # Default bf16-streaming path (perf mode): looser tolerance.
    out_bf16 = jax.block_until_ready(baseline_few_forward(x, *params))
    assert out_bf16.shape == (batch, 1)
    assert jnp.allclose(out_bf16, ref, atol=3e-2, rtol=3e-2), \
        "bf16 path mismatch vs JAX reference"

    print("KERNEL_OK")
</pallas_src>

<mosaic_0001>
module attributes {stable_mosaic.version = 11 : i64} {
  func.func @baseline_few_kernel(%arg0: i32, %arg1: memref<8x128xf32, #tpu.memory_space<vmem>>, %arg2: memref<128x128xf32, #tpu.memory_space<vmem>>, %arg3: memref<4x128xf32, #tpu.memory_space<vmem>>, %arg4: memref<1x8xf32, #tpu.memory_space<vmem>>, %arg5: memref<8x128xf32, #tpu.memory_space<vmem>>) attributes {dimension_semantics = [#tpu.dimension_semantics<arbitrary>], iteration_bounds = array<i64: 1>, scalar_prefetch = 0 : i64, scratch_operands = 1 : i64, tpu.core_type = #tpu.core_type<tc>, window_params = [{transform_indices = @transform_0, window_bounds = array<i64: 8, 128>}, {transform_indices = @transform_1, window_bounds = array<i64: 128, 128>}, {pipeline_mode = #tpu.pipeline_mode<synchronous>, transform_indices = @transform_2, window_bounds = array<i64: 4, 128>}, {pipeline_mode = #tpu.pipeline_mode<synchronous>, transform_indices = @transform_3, window_bounds = array<i64: 1, 8>}]} {
    %c0_i32 = arith.constant 0 : i32
    %0 = arith.cmpi eq, %arg0, %c0_i32 : i32
    %1 = arith.extui %0 : i1 to i32
    %c0_i32_0 = arith.constant 0 : i32
    %2 = arith.cmpi ne, %1, %c0_i32_0 : i32
    scf.if %2 {
      %cst_10 = arith.constant 0.000000e+00 : f32
      %12 = vector.broadcast %cst_10 : f32 to vector<8x128xf32>
      %c0_11 = arith.constant 0 : index
      %c0_12 = arith.constant 0 : index
      %13 = vector.load %arg5[%c0_11, %c0_12] : memref<8x128xf32, #tpu.memory_space<vmem>>, vector<8x128xf32>
      tpu.vector_store %arg5[%c0_11, %c0_12], %12 {strides = array<i32>} : memref<8x128xf32, #tpu.memory_space<vmem>>, vector<8x128xf32>,
    } else {
    }
    %c0 = arith.constant 0 : index
    %c0_1 = arith.constant 0 : index
    %3 = vector.load %arg5[%c0, %c0_1] : memref<8x128xf32, #tpu.memory_space<vmem>>, vector<8x128xf32>
    %c0_2 = arith.constant 0 : index
    %c0_3 = arith.constant 0 : index
    %4 = vector.load %arg1[%c0_2, %c0_3] : memref<8x128xf32, #tpu.memory_space<vmem>>, vector<8x128xf32>
    %c0_4 = arith.constant 0 : index
    %c0_5 = arith.constant 0 : index
    %5 = vector.load %arg2[%c0_4, %c0_5] : memref<128x128xf32, #tpu.memory_space<vmem>>, vector<128x128xf32>
    %cst = arith.constant dense<0.000000e+00> : vector<8x128xf32>
    %6 = tpu.matmul %4, %5, %cst {dimension_numbers = #tpu.dot_dimension_numbers<[1], [0], [0], [1], [0, 0, 1, 1], [], []>} : vector<8x128xf32>, vector<128x128xf32>, vector<8x128xf32> -> vector<8x128xf32>
    %7 = arith.addf %3, %6 : vector<8x128xf32>
    %c0_6 = arith.constant 0 : index
    %c0_7 = arith.constant 0 : index
    %8 = vector.load %arg5[%c0_6, %c0_7] : memref<8x128xf32, #tpu.memory_space<vmem>>, vector<8x128xf32>
    tpu.vector_store %arg5[%c0_6, %c0_7], %7 {strides = array<i32>} : memref<8x128xf32, #tpu.memory_space<vmem>>, vector<8x128xf32>,
    %c0_i32_8 = arith.constant 0 : i32
    %9 = arith.cmpi eq, %arg0, %c0_i32_8 : i32
    %10 = arith.extui %9 : i1 to i32
    %c0_i32_9 = arith.constant 0 : i32
    %11 = arith.cmpi ne, %10, %c0_i32_9 : i32
    scf.if %11 {
      %c0_10 = arith.constant 0 : index
      %c0_11 = arith.constant 0 : index
      %12 = vector.load %arg5[%c0_10, %c0_11] : memref<8x128xf32, #tpu.memory_space<vmem>>, vector<8x128xf32>
      %cst_12 = arith.constant dense<0.000000e+00> : vector<128xf32>
      %13 = vector.multi_reduction <add>, %12, %cst_12 [0] : vector<8x128xf32> to vector<128xf32>
      %14 = vector.shape_cast %13 : vector<128xf32> to vector<1x128xf32>
      %cst_13 = arith.constant 1.250000e-01 : f32
      %15 = vector.broadcast %cst_13 : f32 to vector<1x128xf32>
      %16 = arith.mulf %14, %15 : vector<1x128xf32>
      %17 = vector.broadcast %16 : vector<1x128xf32> to vector<8x128xf32>
      %18 = arith.subf %12, %17 : vector<8x128xf32>
      %19 = arith.mulf %18, %18 : vector<8x128xf32>
      %cst_14 = arith.constant dense<0.000000e+00> : vector<128xf32>
      %20 = vector.multi_reduction <add>, %19, %cst_14 [0] : vector<8x128xf32> to vector<128xf32>
      %21 = vector.shape_cast %20 : vector<128xf32> to vector<1x128xf32>
      %cst_15 = arith.constant 1.250000e-01 : f32
      %22 = vector.broadcast %cst_15 : f32 to vector<1x128xf32>
      %23 = arith.mulf %21, %22 : vector<1x128xf32>
      %c0_16 = arith.constant 0 : index
      %c0_17 = arith.constant 0 : index
      %24 = vector.load %arg3[%c0_16, %c0_17] : memref<4x128xf32, #tpu.memory_space<vmem>>, vector<1x128xf32>
      %c1 = arith.constant 1 : index
      %c0_18 = arith.constant 0 : index
      %25 = vector.load %arg3[%c1, %c0_18] : memref<4x128xf32, #tpu.memory_space<vmem>>, vector<1x128xf32>
      %cst_19 = arith.constant 9.99999974E-6 : f32
      %26 = vector.broadcast %cst_19 : f32 to vector<1x128xf32>
      %27 = arith.addf %23, %26 : vector<1x128xf32>
      %28 = math.rsqrt %27 : vector<1x128xf32>
      %29 = arith.mulf %24, %28 : vector<1x128xf32>
      %30 = arith.mulf %16, %29 : vector<1x128xf32>
      %31 = arith.subf %25, %30 : vector<1x128xf32>
      %32 = vector.broadcast %29 : vector<1x128xf32> to vector<8x128xf32>
      %33 = arith.mulf %12, %32 : vector<8x128xf32>
      %34 = vector.broadcast %31 : vector<1x128xf32> to vector<8x128xf32>
      %35 = arith.addf %33, %34 : vector<8x128xf32>
      %cst_20 = arith.constant 0.000000e+00 : f32
      %36 = vector.broadcast %cst_20 : f32 to vector<8x128xf32>
      %37 = arith.maximumf %35, %36 : vector<8x128xf32>
      %c2 = arith.constant 2 : index
      %c0_21 = arith.constant 0 : index
      %38 = vector.load %arg3[%c2, %c0_21] : memref<4x128xf32, #tpu.memory_space<vmem>>, vector<1x128xf32>
      %c3 = arith.constant 3 : index
      %c0_22 = arith.constant 0 : index
      %39 = vector.load %arg3[%c3, %c0_22] : memref<4x128xf32, #tpu.memory_space<vmem>>, vector<1x1xf32>
      %cst_23 = arith.constant dense<0.000000e+00> : vector<1x8xf32>
      %40 = tpu.matmul %38, %37, %cst_23 {dimension_numbers = #tpu.dot_dimension_numbers<[1], [1], [0], [0], [0, 0, 1, 0], [], []>} : vector<1x128xf32>, vector<8x128xf32>, vector<1x8xf32> -> vector<1x8xf32>
      %41 = vector.broadcast %39 : vector<1x1xf32> to vector<1x8xf32>
      %42 = arith.addf %40, %41 : vector<1x8xf32>
      %cst_24 = arith.constant 0.000000e+00 : f32
      %43 = vector.broadcast %cst_24 : f32 to vector<1x8xf32>
      %44 = arith.maximumf %42, %43 : vector<1x8xf32>
      %45 = arith.negf %44 : vector<1x8xf32>
      %46 = math.exp %45 : vector<1x8xf32>
      %cst_25 = arith.constant 1.000000e+00 : f32
      %47 = vector.broadcast %cst_25 : f32 to vector<1x8xf32>
      %48 = arith.addf %47, %46 : vector<1x8xf32>
      %49 = arith.divf %47, %48 : vector<1x8xf32>
      %c0_26 = arith.constant 0 : index
      %c0_27 = arith.constant 0 : index
      %50 = vector.load %arg4[%c0_26, %c0_27] : memref<1x8xf32, #tpu.memory_space<vmem>>, vector<1x8xf32>
      tpu.vector_store %arg4[%c0_26, %c0_27], %49 {strides = array<i32>} : memref<1x8xf32, #tpu.memory_space<vmem>>, vector<1x8xf32>,
    } else {
    }
    return
  }
  func.func @transform_0(%arg0: i32) -> (i32, i32) {
    %c0_i32 = arith.constant 0 : i32
    %c0_i32_0 = arith.constant 0 : i32
    return %c0_i32, %arg0 : i32, i32
  }
  func.func @transform_1(%arg0: i32) -> (i32, i32) {
    %c0_i32 = arith.constant 0 : i32
    %c0_i32_0 = arith.constant 0 : i32
    return %arg0, %c0_i32 : i32, i32
  }
  func.func @transform_2(%arg0: i32) -> (i32, i32) {
    %c0_i32 = arith.constant 0 : i32
    %c0_i32_0 = arith.constant 0 : i32
    %c0_i32_1 = arith.constant 0 : i32
    return %c0_i32, %c0_i32_0 : i32, i32
  }
  func.func @transform_3(%arg0: i32) -> (i32, i32) {
    %c0_i32 = arith.constant 0 : i32
    %c0_i32_0 = arith.constant 0 : i32
    %c0_i32_1 = arith.constant 0 : i32
    return %c0_i32, %c0_i32_0 : i32, i32
  }
}

</mosaic_0001>

<bundles_post_ra>
// kernel: tpu_custom_call.1
= control target key start
LH: loop header
LB: loop body
LE: loop exit
PB: predicated region body
PF: predicated region fallthrough
CT: control target
= control target key end

     0   :  { %8 = vsyncpa [#allocation4], 0  ;;  %s490_s0 = inlined_call_operand.hbm [shape: f32[8,128], index: 0, kind: input, shape index: {}]   ;;  %s491_s1 = inlined_call_operand.hbm [shape: f32[128,128], index: 1, kind: input, shape index: {}]   ;;  %s492_s2 = inlined_call_operand.hbm [shape: f32[4,128], index: 2, kind: input, shape index: {}]   ;;  %s493_s3 = inlined_call_operand.hbm [shape: f32[1,8], index: 3, kind: output, shape index: {}]  }
   0x1   :  { %9 = vsyncpa [#allocation7], 0 }
   0x2   :  { %10 = vsyncpa [#allocation5], 0  ;;  %s449_s12 = smov [#allocation6]  }
   0x3   :  { %s26_s13 = sshll.u32 %s449_s12, 4  ;;  %s27_s13 = int_to_ptr.vmem [resolvable:$true] %s26_s13 }
   0x4   :  { %s371_s14 = scalar_lea.vmem %s27_s13, 2048  ;;  %p376_p1 = scmp.lt.s32.totalorder %s27_s13, %s27_s13 }
   0x5   :  { %p372_p0 = scmp.ne.s32.totalorder %s27_s13, %s371_s14  ;;  %p377_p2 = scmp.lt.s32.totalorder %s371_s14, %s371_s14 }
   0x7   :  { %p378_p3 = por %p377_p2, %p376_p1 }
   0x9   :  { %p379_p4 = pnand %p378_p3, %p372_p0 }
   0xb   :  { %382 = shalt.err (!%p379_p4)
}
   0xc   :  { %s450_s15 = smov 128   ;;  %s451_s16 = smov 8  }
   0xd   :  { %32 = dma.hbm_to_vmem [thread:$0]  %s491_s1, 2048, %s27_s13, [#allocation7], %s450_s15, %s450_s15, %s451_s16  }
   0xe   :  { %s452_s19 = smov [#allocation3]   ;;  %s453_s21 = smov [#allocation8]  }
   0xf   :  { %s17_s20 = sshll.u32 %s452_s19, 4  ;;  %s39_s22 = sshll.u32 %s453_s21, 4  ;;  %s18_s20 = int_to_ptr.vmem [resolvable:$true] %s17_s20  ;;  %s40_s22 = int_to_ptr.vmem [resolvable:$true] %s39_s22 }
  0x10   :  { %s391_s23 = scalar_lea.vmem %s18_s20, 128  ;;  %p396_p6 = scmp.lt.s32.totalorder %s18_s20, %s18_s20 }
  0x11   :  { %p392_p5 = scmp.ne.s32.totalorder %s18_s20, %s391_s23  ;;  %p397_p7 = scmp.lt.s32.totalorder %s391_s23, %s391_s23 }
  0x13   :  { %p398_p8 = por %p397_p7, %p396_p6 }
  0x15   :  { %p399_p9 = pnand %p398_p8, %p392_p5 }
  0x17   :  { %402 = shalt.err (!%p399_p9)
}
  0x18   :  { %20 = dma.hbm_to_vmem [thread:$0]  %s490_s0, 128, %s18_s20, [#allocation4]  }
  0x19   :  { %s411_s26 = scalar_lea.vmem %s40_s22, 64  ;;  %p416_p11 = scmp.lt.s32.totalorder %s40_s22, %s40_s22 }
  0x1a   :  { %p412_p10 = scmp.ne.s32.totalorder %s40_s22, %s411_s26  ;;  %p417_p12 = scmp.lt.s32.totalorder %s411_s26, %s411_s26 }
  0x1c   :  { %p418_p13 = por %p417_p12, %p416_p11 }
  0x1e   :  { %p419_p0 = pnand %p418_p13, %p412_p10 }
  0x20   :  { %422 = shalt.err (!%p419_p0)
}
  0x21   :  { %42 = dma.hbm_to_vmem [thread:$0]  %s492_s2, 64, %s40_s22, [#allocation7]  }
  0x22   :  { %443 = dma.done.wait [#allocation4], 128  }
  0x23   :  { %444 = vsyncadd [#allocation4], 4294967168 }
  0x24   :  { %445 = dma.done.wait [#allocation7], 2112  }
  0x25   :  { %446 = vsyncadd [#allocation7], 4294965184  ;;  %v454_v0 = vmov 0.0   ;;  %vm455_vm0 = vmmov 0   ;;  %v74_v1 = vld [vmem:[#allocation6 + $0x78] sm:$0xff]  ;;  %v73_v2 = vld [vmem:[#allocation6 + $0x70] sm:$0xff]  ;;  %v174_v39 = vlaneseq }
  0x26   :  { %307 = vmatprep.subr.mxu0 %v454_v0  ;;  %339 = vmatprep.mubr.msk.f32.mxu0 %vm455_vm0, %v454_v0  ;;  %v72_v3 = vld [vmem:[#allocation6 + $0x68] sm:$0xff]  ;;  %v71_v4 = vld [vmem:[#allocation6 + $0x60] sm:$0xff]  ;;  %v70_v5 = vld [vmem:[#allocation6 + $0x58] sm:$0xff]  ;;  %v456_v19 = vmov 0   ;;  %s457_s0 = smov [#allocation9]   ;;  %vm269_vm1 = vcmask 57344  }
  0x27   :  { %342 = vmatprep.subr.mxu1 %v454_v0  ;;  %344 = vmatprep.mubr.msk.f32.mxu1 %vm455_vm0, %v454_v0  ;;  %v69_v6 = vld [vmem:[#allocation6 + $0x50] sm:$0xff]  ;;  %v68_v7 = vld [vmem:[#allocation6 + $0x48] sm:$0xff]  ;;  %v67_v8 = vld [vmem:[#allocation6 + $0x40] sm:$0xff]  ;;  %v175_v40 = vshrl.u32 %v174_v39, 7  ;;  %s277_s2 = sshll.u32 %s457_s0, 4  ;;  %s278_s2 = int_to_ptr.vmem [resolvable:$true] %s277_s2 }
  0x28   :  { %308 = vmatpush3.msra.mxu0 %v74_v1  ;;  %v66_v9 = vld [vmem:[#allocation6 + $0x38] sm:$0xff]  ;;  %v65_v10 = vld [vmem:[#allocation6 + $0x30] sm:$0xff]  ;;  %v64_v11 = vld [vmem:[#allocation6 + $0x28] sm:$0xff]  ;;  %356 = vset.pattern.permute.xlu0 %v456_v19  ;;  %s423_s28 = scalar_lea.vmem %s278_s2, 16  ;;  %s427_s29 = scalar_lea.vmem %s278_s2, 32 }
  0x29   :  { %309 = vmatprep.subr.mxu0 %v454_v0  ;;  %v63_v12 = vld [vmem:[#allocation6 + $0x20] sm:$0xff]  ;;  %v62_v13 = vld [vmem:[#allocation6 + $0x18] sm:$0xff]  ;;  %v61_v14 = vld [vmem:[#allocation6 + $0x10] sm:$0xff]  ;;  %v176_v42 = vsub.s32 0, %v175_v40  ;;  %p424_p1 = scmp.ne.s32.totalorder %s278_s2, %s423_s28  ;;  %p428_p2 = scmp.lt.s32.totalorder %s278_s2, %s278_s2 }
  0x2a   :  { %310 = vmatpush3.msra.mxu0 %v73_v2  ;;  %v60_v15 = vld [vmem:[#allocation6 + $0x8] sm:$0xff]  ;;  %v59_v16 = vld [vmem:[#allocation6] sm:$0xff]  ;;  %v58_v17 = vld [vmem:[#allocation3] sm:$0xff]  ;;  %p429_p3 = scmp.lt.s32.totalorder %s427_s29, %s423_s28 }
  0x2b   :  { %311 = vmatprep.subr.mxu0 %v454_v0  ;;  %v186_v18 = vld [vmem:[#allocation8 + $0x3] sm:$0x1]  ;;  %v167_v41 = vld [vmem:[#allocation8] sm:$0x1]  ;;  %v168_v45 = vld [vmem:[#allocation8 + $0x1] sm:$0x1] }
  0x2c   :  { %312 = vmatpush3.msra.mxu0 %v72_v3  ;;  %189 = vperm.xlu0 %356, %v186_v18   ;;  %v185_v53 = vld [vmem:[#allocation8 + $0x2] sm:$0x1]  ;;  %p430_p4 = por %p429_p3, %p428_p2 }
  0x2d   :  { %313 = vmatprep.subr.mxu0 %v454_v0 }
  0x2e   :  { %314 = vmatpush3.msra.mxu0 %v71_v4  ;;  %p431_p5 = pnand %p430_p4, %p424_p1 }
  0x2f   :  { %315 = vmatprep.subr.mxu0 %v454_v0 }
  0x30   :  { %316 = vmatpush3.msra.mxu0 %v70_v5 }
  0x31   :  { %317 = vmatprep.subr.mxu0 %v454_v0 }
  0x32   :  { %318 = vmatpush3.msra.mxu0 %v69_v6 }
  0x33   :  { %319 = vmatprep.subr.mxu0 %v454_v0 }
  0x34   :  { %320 = vmatpush3.msra.mxu0 %v68_v7 }
  0x35   :  { %321 = vmatprep.subr.mxu0 %v454_v0 }
  0x36   :  { %322 = vmatpush3.msra.mxu0 %v67_v8 }
  0x37   :  { %323 = vmatprep.subr.mxu0 %v454_v0 }
  0x38   :  { %324 = vmatpush3.msra.mxu0 %v66_v9 }
  0x39   :  { %325 = vmatprep.subr.mxu0 %v454_v0 }
  0x3a   :  { %326 = vmatpush3.msra.mxu0 %v65_v10 }
  0x3b   :  { %327 = vmatprep.subr.mxu0 %v454_v0 }
  0x3c   :  { %328 = vmatpush3.msra.mxu0 %v64_v11 }
  0x3d   :  { %329 = vmatprep.subr.mxu0 %v454_v0 }
  0x3e   :  { %330 = vmatpush3.msra.mxu0 %v63_v12 }
  0x3f   :  { %331 = vmatprep.subr.mxu0 %v454_v0 }
  0x40   :  { %332 = vmatpush3.msra.mxu0 %v62_v13 }
  0x41   :  { %333 = vmatprep.subr.mxu0 %v454_v0 }
  0x42   :  { %334 = vmatpush3.msra.mxu0 %v61_v14 }
  0x43   :  { %335 = vmatprep.subr.mxu0 %v454_v0 }
  0x44   :  { %336 = vmatpush3.msra.mxu0 %v60_v15 }
  0x45   :  { %337 = vmatprep.subr.mxu0 %v454_v0 }
  0x46   :  { %338 = vmatpush3.msra.mxu0 %v59_v16 }
  0x47   :  { %340 = vmatmul.mubr.f32.vlgmr.msra.gmra.mxu0 %v58_v17 }
  0xa7   :  { %v190_v54 = vpop.permute.xlu0 %189 }
 0x107   :  { %v141_v20 = vpop.f32.mrf.mxu0 }
 0x108   :  { %v151_v21 = vrot.slane %v141_v20, 4 }
 0x109   :  { %v341_v22 = vpop.f32.mrf.mxu0 }
 0x10a   :  { %v152_v23 = vadd.f32 %v151_v21, %v141_v20 }
 0x10c   :  { %v153_v24 = vrot.slane %v152_v23, 2 }
 0x10e   :  { %v154_v25 = vadd.f32 %v153_v24, %v152_v23 }
 0x110   :  { %v155_v26 = vrot.slane %v154_v25, 1 }
 0x112   :  { %v156_v27 = vadd.f32 %v155_v26, %v154_v25 }
 0x114   :  { %v157_v28 = vmul.f32 0.125, %v156_v27 }
 0x116   :  { %v158_v29 = vsub.f32 %v141_v20, %v157_v28 }
 0x118   :  { %v159_v30 = vmul.f32 %v158_v29, %v158_v29 }
 0x11a   :  { %v160_v31 = vrot.slane %v159_v30, 4 }
 0x11c   :  { %v161_v32 = vadd.f32 %v160_v31, %v159_v30 }
 0x11e   :  { %v162_v33 = vrot.slane %v161_v32, 2 }
 0x120   :  { %v163_v34 = vadd.f32 %v162_v33, %v161_v32 }
 0x122   :  { %v164_v35 = vrot.slane %v163_v34, 1 }
 0x124   :  { %v165_v36 = vadd.f32 %v164_v35, %v163_v34 }
 0x126   :  { %v166_v37 = vmul.f32 0.125, %v165_v36 }
 0x128   :  { %v169_v38 = vadd.f32 1e-05, %v166_v37 }
 0x12a   :  { %357 = vrsqrt.f32 %v169_v38 }
 0x137   :  { %v358_v43 = vpop.eup %357 }
 0x138   :  { %v171_v44 = vmul.f32 %v358_v43, %v167_v41 }
 0x13a   :  { %v172_v46 = vmul.f32 %v171_v44, %v157_v28  ;;  %v177_v47 = vrot.slane %v171_v44, %v176_v42 }
 0x13c   :  { %v173_v48 = vsub.f32 %v168_v45, %v172_v46  ;;  %v178_v49 = vmul.f32 %v177_v47, %v141_v20 }
 0x13e   :  { %v182_v50 = vrot.slane %v173_v48, %v176_v42 }
 0x140   :  { %v183_v51 = vadd.f32 %v182_v50, %v178_v49 }
 0x142   :  { %v184_v52 = vmax.f32 %v183_v51, 0.0 }
 0x144   :  { %343 = vmatpush3.xpose.msra.mxu1 %v184_v52 }
 0x147   :  { %345 = vmatmul.mubr.f32.vlgmr.msra.gmra.mxu1 %v185_v53 }
 0x207   :  { %v258_v55 = vpop.f32.mrf.mxu1 }
 0x208   :  { %v259_v56 = vadd.f32 %v258_v55, %v190_v54 }
 0x209   :  { %v346_v57 = vpop.f32.mrf.mxu1 }
 0x20a   :  { %v262_v58 = vmax.f32 %v259_v56, 0.0 }
 0x20c   :  { %v287_v59 = vmul.f32 -1.442695, %v262_v58 }
 0x20e   :  { %359 = vpow2.f32 %v287_v59 }
 0x21b   :  { %v360_v60 = vpop.eup %359 }
 0x21c   :  { %v266_v61 = vadd.f32 1.0, %v360_v60 }
 0x21e   :  { %361 = vrcp.f32 %v266_v61 }
 0x22b   :  { %v362_v62 = vpop.eup %361 }
 0x22c   :  { %270 = vst.msk [vmem:[#allocation9] sm:$0x1] %vm269_vm1, %v362_v62 }
 0x22d   :  { %434 = shalt.err (!%p431_p5)
}
 0x22e   :  { %280 = dma.vmem_to_hbm [thread:$0]  %s278_s2, 16, %s493_s3, [#allocation5]  }
 0x22f   :  { %447 = dma.done.wait [#allocation5], 16  }
 0x230   :  { %448 = vsyncadd [#allocation5], 4294967280 }
 0x231   :  { %284 = vsyncpa [#allocation4], 1 }
 0x232   :  { %285 = vsyncpa [#allocation7], 1 }
 0x233   :  { %286 = vsyncpa [#allocation5], 1 }

</bundles_post_ra>
